<compile_context>
chip_gen: v7x
topology: tpu7x:2x2x1
jax: 0.10.0
libtpu: 0.0.40
codegen_flags: <defaults>
</compile_context>

<pallas_src>
import jax
import jax.numpy as jnp
from jax.experimental import pallas as pl
from jax.experimental.pallas import tpu as pltpu

LANES = 128
MAX_BLOCK_ROWS = 2048   # ~5 MiB of f32 input DMA per grid step; fits every generation


def _make_kernel(tr, lanes, total_rows, rb_total, rb_per_split, needs_mask):
    """Kernel factory: static tiling facts are baked in as Python constants."""

    def kernel(w_ref,                          # SMEM (2,) f32 class weights
               l0_ref, l1_ref, t_ref,          # VMEM (1,2,tr,lanes) x2, (1,tr,lanes)
               num0_ref, num1_ref, den_ref,    # VMEM (1,1,1,lanes) per (batch, split)
               acc0_ref, acc1_ref, accw_ref):  # VMEM (tr,lanes) f32 accumulators
        s = pl.program_id(1)                   # row-split index (v7x 2nd parallel axis)
        r = pl.program_id(2)                   # row-block index within the split

        @pl.when(r == 0)
        def _():
            acc0_ref[...] = jnp.zeros_like(acc0_ref)
            acc1_ref[...] = jnp.zeros_like(acc1_ref)
            accw_ref[...] = jnp.zeros_like(accw_ref)

        t = t_ref[0]                           # (tr, lanes) integer labels
        is0 = t == 0
        is1 = t == 1
        # NOTE: labels outside {0,1} contribute to neither numerator nor denominator
        # (torch CrossEntropyLoss would error); acceptable for this 2-class module.
        w_lbl = jnp.where(is0, w_ref[0], 0.0) + jnp.where(is1, w_ref[1], 0.0)

        if needs_mask:
            # ragged last block / clamped fully-out-of-range block: mask by global row
            rb_un = s * rb_per_split + r
            rb = jnp.minimum(rb_un, rb_total - 1)
            row0 = rb * tr
            row_ids = jax.lax.broadcasted_iota(jnp.int32, (tr, lanes), 0)
            mask = jnp.logical_and(row0 + row_ids < total_rows, rb_un < rb_total)
            w_pix = jnp.where(mask, w_lbl, 0.0)
        else:
            mask = None
            w_pix = w_lbl

        def weighted_nll(l_ref):
            # closed-form 2-class CE: -log_softmax[label] = softplus(-(x_t - x_other))
            l = l_ref[...]                      # (1, 2, tr, lanes)
            x0 = l[0, 0].astype(jnp.float32)
            x1 = l[0, 1].astype(jnp.float32)
            diff = x1 - x0
            a = jnp.abs(diff)
            rp = jnp.maximum(diff, 0.0)         # relu(diff)  == hinge for label 0
            hinge = jnp.where(is0, rp, a - rp)  # a - rp == relu(-diff): label-1 hinge
            nll = hinge + jnp.log1p(jnp.exp(-a))
            if mask is not None:
                nll = jnp.where(mask, nll, 0.0)  # kill garbage/NaN from OOB rows
            return w_pix * nll

        acc0_ref[...] += weighted_nll(l0_ref)
        acc1_ref[...] += weighted_nll(l1_ref)
        accw_ref[...] += w_pix

        @pl.when(r == pl.num_programs(2) - 1)
        def _():
            # single cross-sublane reduce per (batch, split); lane/batch sums in JAX
            num0_ref[0, 0] = jnp.sum(acc0_ref[...], axis=0, keepdims=True)
            num1_ref[0, 0] = jnp.sum(acc1_ref[...], axis=0, keepdims=True)
            den_ref[0, 0] = jnp.sum(accw_ref[...], axis=0, keepdims=True)

    return kernel


def multi_task_loss_wo(logits0, logits1, targets, weight, log_vars, *,
                       max_block_rows=MAX_BLOCK_ROWS):
    """Pallas implementation of MultiTaskLossWrapper_wo.forward (minus the model).

    logits0/logits1: (B, 2, H, W) float (any float dtype; bf16 halves HBM traffic),
    targets: (B, H, W) int, weight: (2,) class weights, log_vars: (2,).
    Returns (total_loss_scalar, log_vars).  (The torch module returns
    log_vars.data.tolist(); convert to a host list outside jit if needed.)
    """
    B, C, H, W = logits0.shape
    assert C == 2, "this kernel implements the 2-class case (weight has 2 entries)"
    assert logits1.shape == logits0.shape
    assert targets.shape == (B, H, W)

    hw = H * W
    if hw % LANES == 0:
        # contiguous (free) reshape to a lane-dense (B, 2, rows, 128) view
        total_rows, lanes = hw // LANES, LANES
        l0 = logits0.reshape(B, C, total_rows, lanes)
        l1 = logits1.reshape(B, C, total_rows, lanes)
        tgt = targets.reshape(B, total_rows, lanes)
    else:
        # ragged H*W: consume NCHW directly (lanes = W); NO jnp.pad HBM copy
        total_rows, lanes = H, W
        l0, l1, tgt = logits0, logits1, targets
    if not jnp.issubdtype(tgt.dtype, jnp.integer):
        tgt = tgt.astype(jnp.int32)

    # --- tile sizing: biggest row block that respects the VMEM budget -------------
    lanes_pad = -(-lanes // LANES) * LANES
    logit_isz = jnp.dtype(logits0.dtype).itemsize
    tgt_isz = jnp.dtype(tgt.dtype).itemsize
    # per row (of lanes_pad px): 2 logit maps x 2 classes x 2 bufs + targets x 2 bufs
    # + 3 f32 accumulators
    bytes_per_row = lanes_pad * (2 * 2 * 2 * logit_isz + 2 * tgt_isz + 3 * 4)
    vmem_budget = 28 << 20
    rows_cap = max(8, (vmem_budget // bytes_per_row) // 8 * 8)
    eff_max_rows = min(max(8, (max_block_rows // 8) * 8), rows_cap)

    if total_rows <= eff_max_rows:
        tr = total_rows              # single block: full-dim block (no 8-multiple need)
        rb_total = 1
    else:
        tr = eff_max_rows            # multiple of 8
        rb_total = -(-total_rows // tr)

    # 2nd parallel axis so both v7x TensorCores are used even at B == 1 / odd B
    n_splits = 2 if rb_total >= 2 else 1
    rb_per_split = -(-rb_total // n_splits)
    needs_clamp = n_splits * rb_per_split > rb_total
    needs_mask = needs_clamp or (rb_total * tr != total_rows)

    if needs_clamp:
        def rb_of(s, r):
            return jnp.minimum(s * rb_per_split + r, rb_total - 1)
    else:
        def rb_of(s, r):
            return s * rb_per_split + r

    lmap = lambda b, s, r, w: (b, 0, rb_of(s, r), 0)
    tmap = lambda b, s, r, w: (b, rb_of(s, r), 0)
    omap = lambda b, s, r, w: (b, s, 0, 0)

    # explicit VMEM limit: clears v5e's 16 MiB scoped default, stays << v7x's 64 MiB
    rows_pad = -(-tr // 8) * 8
    px = rows_pad * lanes_pad
    vmem_est = 2 * (2 * 2 * px * logit_isz + px * tgt_isz) + 3 * px * 4
    vmem_limit = int(min(max(vmem_est + (8 << 20), 24 << 20), 48 << 20))

    kernel = _make_kernel(tr, lanes, total_rows, rb_total, rb_per_split, needs_mask)

    num0, num1, den = pl.pallas_call(
        kernel,
        out_shape=(
            jax.ShapeDtypeStruct((B, n_splits, 1, lanes), jnp.float32),
            jax.ShapeDtypeStruct((B, n_splits, 1, lanes), jnp.float32),
            jax.ShapeDtypeStruct((B, n_splits, 1, lanes), jnp.float32),
        ),
        grid_spec=pltpu.PrefetchScalarGridSpec(
            num_scalar_prefetch=1,             # class weights live in SMEM
            grid=(B, n_splits, rb_per_split),
            in_specs=[
                pl.BlockSpec((1, C, tr, lanes), lmap),
                pl.BlockSpec((1, C, tr, lanes), lmap),
                pl.BlockSpec((1, tr, lanes), tmap),
            ],
            out_specs=[
                pl.BlockSpec((1, 1, 1, lanes), omap),
                pl.BlockSpec((1, 1, 1, lanes), omap),
                pl.BlockSpec((1, 1, 1, lanes), omap),
            ],
            scratch_shapes=[pltpu.VMEM((tr, lanes), jnp.float32)] * 3,
        ),
        compiler_params=pltpu.CompilerParams(
            dimension_semantics=("parallel", "parallel", "arbitrary"),
            vmem_limit_bytes=vmem_limit),
    )(weight.astype(jnp.float32), l0, l1, tgt)

    # tiny final combine in plain JAX (exact weighted mean over all pixels)
    den_total = jnp.sum(den)
    loss0 = jnp.sum(num0) / den_total
    loss1 = jnp.sum(num1) / den_total
    lv0 = log_vars[0].astype(jnp.float32)
    lv1 = log_vars[1].astype(jnp.float32)
    total = jnp.exp(-lv0) * loss0 + lv0 + jnp.exp(-lv1) * loss1 + lv1
    return total, log_vars


def _toy_model(x, w_head0, b_head0, w_head1, b_head1, out_dtype=jnp.float32):
    # Synthetic stand-in for `self.model`: two 1x1-conv heads producing class logits.
    # (The model is external to the wrapper; kept as plain-JAX glue.)
    l0 = jnp.einsum('co,bohw->bchw', w_head0, x) + b_head0[None, :, None, None]
    l1 = jnp.einsum('co,bohw->bchw', w_head1, x) + b_head1[None, :, None, None]
    return l0.astype(out_dtype), l1.astype(out_dtype)


def _ref_total(l0, l1, t, weight, log_vars):
    # plain-JAX reference (matches torch.nn.CrossEntropyLoss(weight) semantics)
    def ce(logits, tt):
        lp = jax.nn.log_softmax(logits.astype(jnp.float32), axis=1)
        oh = jax.nn.one_hot(tt, 2, axis=1, dtype=jnp.float32)
        nll = -jnp.sum(lp * oh, axis=1)          # (B,H,W)
        wp = weight[tt]                          # (B,H,W)
        return jnp.sum(wp * nll) / jnp.sum(wp)

    loss0 = ce(l0, t)
    loss1 = ce(l1, t)
    return (jnp.exp(-log_vars[0]) * loss0 + log_vars[0]
            + jnp.exp(-log_vars[1]) * loss1 + log_vars[1])


if __name__ == "__main__":
    key = jax.random.PRNGKey(0)
    k1, k2, k3, k4, k5, k6, k7, k8 = jax.random.split(key, 8)

    B, Cin, NUM_CLASSES = 2, 4, 2

    # deterministic params (module __init__: log_vars = zeros(task_num), fixed weight)
    w_head0 = 0.1 * jax.random.normal(k3, (NUM_CLASSES, Cin), jnp.float32)
    w_head1 = 0.1 * jax.random.normal(k4, (NUM_CLASSES, Cin), jnp.float32)
    b_head0 = jnp.zeros((NUM_CLASSES,), jnp.float32)
    b_head1 = jnp.zeros((NUM_CLASSES,), jnp.float32)
    weight = jnp.array([1.0 / 0.9105, 1.0 / 0.0895], jnp.float32)
    log_vars = jnp.zeros((2,), jnp.float32)

    fwd = jax.jit(multi_task_loss_wo, static_argnames=("max_block_rows",))

    # --- test 1: lane-aligned H*W (free reshape path), f32 -----------------------
    H1, W1 = 16, 16
    x1 = jax.random.normal(k1, (B, Cin, H1, W1), jnp.float32)
    t1 = jax.random.randint(k2, (B, H1, W1), 0, NUM_CLASSES, jnp.int32)
    l0a, l1a = _toy_model(x1, w_head0, b_head0, w_head1, b_head1)
    total1, lv = fwd(l0a, l1a, t1, weight, log_vars)
    total1 = jax.block_until_ready(total1)
    ref1 = _ref_total(l0a, l1a, t1, weight, log_vars)
    assert abs(float(total1) - float(ref1)) < 1e-4, (float(total1), float(ref1))

    # --- test 2: H*W not a multiple of 128 (no-pad NCHW path), f32 ---------------
    H2, W2 = 24, 24
    x2 = jax.random.normal(k5, (B, Cin, H2, W2), jnp.float32)
    t2 = jax.random.randint(k6, (B, H2, W2), 0, NUM_CLASSES, jnp.int32)
    l0b, l1b = _toy_model(x2, w_head0, b_head0, w_head1, b_head1)
    total2, _ = fwd(l0b, l1b, t2, weight, log_vars)
    total2 = jax.block_until_ready(total2)
    ref2 = _ref_total(l0b, l1b, t2, weight, log_vars)
    assert abs(float(total2) - float(ref2)) < 1e-4, (float(total2), float(ref2))

    # --- test 3: bf16 logits on the wire + multi-block grid with row split,
    #             ragged last block and clamped out-of-range block (small tile) ----
    H3, W3 = 20, 24
    x3 = jax.random.normal(k7, (B, Cin, H3, W3), jnp.float32)
    t3 = jax.random.randint(k8, (B, H3, W3), 0, NUM_CLASSES, jnp.int32)
    l0c, l1c = _toy_model(x3, w_head0, b_head0, w_head1, b_head1,
                          out_dtype=jnp.bfloat16)
    total3, _ = fwd(l0c, l1c, t3, weight, log_vars, max_block_rows=8)
    total3 = jax.block_until_ready(total3)
    ref3 = _ref_total(l0c, l1c, t3, weight, log_vars)
    assert abs(float(total3) - float(ref3)) < 1e-3 * (1.0 + abs(float(ref3))), (
        float(total3), float(ref3))

    print("KERNEL_OK")
</pallas_src>

<mosaic_0001>
module attributes {stable_mosaic.version = 11 : i64} {
  func.func @kernel(%arg0: i32, %arg1: i32, %arg2: i32, %arg3: memref<2xf32, #tpu.memory_space<smem>>, %arg4: memref<1x2x2x128xf32, #tpu.memory_space<vmem>>, %arg5: memref<1x2x2x128xf32, #tpu.memory_space<vmem>>, %arg6: memref<1x2x128xi32, #tpu.memory_space<vmem>>, %arg7: memref<1x1x1x128xf32, #tpu.memory_space<vmem>>, %arg8: memref<1x1x1x128xf32, #tpu.memory_space<vmem>>, %arg9: memref<1x1x1x128xf32, #tpu.memory_space<vmem>>, %arg10: memref<2x128xf32, #tpu.memory_space<vmem>>, %arg11: memref<2x128xf32, #tpu.memory_space<vmem>>, %arg12: memref<2x128xf32, #tpu.memory_space<vmem>>) attributes {dimension_semantics = [#tpu.dimension_semantics<parallel>, #tpu.dimension_semantics<parallel>, #tpu.dimension_semantics<arbitrary>], iteration_bounds = array<i64: 2, 1, 1>, scalar_prefetch = 1 : i64, scratch_operands = 3 : i64, tpu.core_type = #tpu.core_type<tc>, window_params = [{transform_indices = @transform_0, window_bounds = array<i64: 1, 2, 2, 128>}, {transform_indices = @transform_1, window_bounds = array<i64: 1, 2, 2, 128>}, {transform_indices = @transform_2, window_bounds = array<i64: 1, 2, 128>}, {transform_indices = @transform_3, window_bounds = array<i64: 1, 1, 1, 128>}, {transform_indices = @transform_4, window_bounds = array<i64: 1, 1, 1, 128>}, {transform_indices = @transform_5, window_bounds = array<i64: 1, 1, 1, 128>}]} {
    %c0_i32 = arith.constant 0 : i32
    %0 = arith.cmpi eq, %arg2, %c0_i32 : i32
    %1 = arith.extui %0 : i1 to i32
    %c0_i32_0 = arith.constant 0 : i32
    %2 = arith.cmpi ne, %1, %c0_i32_0 : i32
    scf.if %2 {
      %cst_32 = arith.constant 0.000000e+00 : f32
      %64 = vector.broadcast %cst_32 : f32 to vector<2x128xf32>
      %c0_33 = arith.constant 0 : index
      %c0_34 = arith.constant 0 : index
      %65 = vector.load %arg10[%c0_33, %c0_34] : memref<2x128xf32, #tpu.memory_space<vmem>>, vector<2x128xf32>
      tpu.vector_store %arg10[%c0_33, %c0_34], %64 {strides = array<i32>} : memref<2x128xf32, #tpu.memory_space<vmem>>, vector<2x128xf32>,
      %cst_35 = arith.constant 0.000000e+00 : f32
      %66 = vector.broadcast %cst_35 : f32 to vector<2x128xf32>
      %c0_36 = arith.constant 0 : index
      %c0_37 = arith.constant 0 : index
      %67 = vector.load %arg11[%c0_36, %c0_37] : memref<2x128xf32, #tpu.memory_space<vmem>>, vector<2x128xf32>
      tpu.vector_store %arg11[%c0_36, %c0_37], %66 {strides = array<i32>} : memref<2x128xf32, #tpu.memory_space<vmem>>, vector<2x128xf32>,
      %cst_38 = arith.constant 0.000000e+00 : f32
      %68 = vector.broadcast %cst_38 : f32 to vector<2x128xf32>
      %c0_39 = arith.constant 0 : index
      %c0_40 = arith.constant 0 : index
      %69 = vector.load %arg12[%c0_39, %c0_40] : memref<2x128xf32, #tpu.memory_space<vmem>>, vector<2x128xf32>
      tpu.vector_store %arg12[%c0_39, %c0_40], %68 {strides = array<i32>} : memref<2x128xf32, #tpu.memory_space<vmem>>, vector<2x128xf32>,
    } else {
    }
    %c0 = arith.constant 0 : index
    %c0_1 = arith.constant 0 : index
    %c0_2 = arith.constant 0 : index
    %3 = vector.load %arg6[%c0, %c0_1, %c0_2] : memref<1x2x128xi32, #tpu.memory_space<vmem>>, vector<1x2x128xi32>
    %4 = vector.shape_cast %3 : vector<1x2x128xi32> to vector<2x128xi32>
    %c0_i32_3 = arith.constant 0 : i32
    %5 = vector.broadcast %c0_i32_3 : i32 to vector<2x128xi32>
    %6 = arith.cmpi eq, %4, %5 : vector<2x128xi32>
    %c1_i32 = arith.constant 1 : i32
    %7 = vector.broadcast %c1_i32 : i32 to vector<2x128xi32>
    %8 = arith.cmpi eq, %4, %7 : vector<2x128xi32>
    %c0_4 = arith.constant 0 : index
    %9 = memref.load %arg3[%c0_4] : memref<2xf32, #tpu.memory_space<smem>>
    %cst = arith.constant 0.000000e+00 : f32
    %10 = vector.broadcast %9 : f32 to vector<2x128xf32>
    %11 = vector.broadcast %cst : f32 to vector<2x128xf32>
    %12 = arith.select %6, %10, %11 : vector<2x128xi1>, vector<2x128xf32>
    %c1 = arith.constant 1 : index
    %13 = memref.load %arg3[%c1] : memref<2xf32, #tpu.memory_space<smem>>
    %cst_5 = arith.constant 0.000000e+00 : f32
    %14 = vector.broadcast %13 : f32 to vector<2x128xf32>
    %15 = vector.broadcast %cst_5 : f32 to vector<2x128xf32>
    %16 = arith.select %8, %14, %15 : vector<2x128xi1>, vector<2x128xf32>
    %17 = arith.addf %12, %16 : vector<2x128xf32>
    %c0_6 = arith.constant 0 : index
    %c0_7 = arith.constant 0 : index
    %18 = vector.load %arg10[%c0_6, %c0_7] : memref<2x128xf32, #tpu.memory_space<vmem>>, vector<2x128xf32>
    %c0_8 = arith.constant 0 : index
    %c0_9 = arith.constant 0 : index
    %c0_10 = arith.constant 0 : index
    %c0_11 = arith.constant 0 : index
    %19 = vector.load %arg4[%c0_8, %c0_9, %c0_10, %c0_11] : memref<1x2x2x128xf32, #tpu.memory_space<vmem>>, vector<1x2x2x128xf32>
    %20 = vector.extract_strided_slice %19 {offsets = [0, 0, 0, 0], sizes = [1, 1, 2, 128], strides = [1, 1, 1, 1]} : vector<1x2x2x128xf32> to vector<1x1x2x128xf32>
    %21 = vector.shape_cast %20 : vector<1x1x2x128xf32> to vector<2x128xf32>
    %22 = vector.extract_strided_slice %19 {offsets = [0, 1, 0, 0], sizes = [1, 1, 2, 128], strides = [1, 1, 1, 1]} : vector<1x2x2x128xf32> to vector<1x1x2x128xf32>
    %23 = vector.shape_cast %22 : vector<1x1x2x128xf32> to vector<2x128xf32>
    %24 = arith.subf %23, %21 : vector<2x128xf32>
    %25 = math.absf %24 : vector<2x128xf32>
    %cst_12 = arith.constant 0.000000e+00 : f32
    %26 = vector.broadcast %cst_12 : f32 to vector<2x128xf32>
    %27 = arith.maximumf %24, %26 : vector<2x128xf32>
    %28 = arith.subf %25, %27 : vector<2x128xf32>
    %29 = arith.select %6, %27, %28 : vector<2x128xi1>, vector<2x128xf32>
    %cst_13 = arith.constant 0.000000e+00 : f32
    %30 = vector.broadcast %cst_13 : f32 to vector<2x128xf32>
    %31 = arith.subf %30, %25 : vector<2x128xf32>
    %32 = math.exp %31 : vector<2x128xf32>
    %33 = math.log1p %32 : vector<2x128xf32>
    %34 = arith.addf %29, %33 : vector<2x128xf32>
    %35 = arith.mulf %17, %34 : vector<2x128xf32>
    %36 = arith.addf %18, %35 : vector<2x128xf32>
    %c0_14 = arith.constant 0 : index
    %c0_15 = arith.constant 0 : index
    %37 = vector.load %arg10[%c0_14, %c0_15] : memref<2x128xf32, #tpu.memory_space<vmem>>, vector<2x128xf32>
    tpu.vector_store %arg10[%c0_14, %c0_15], %36 {strides = array<i32>} : memref<2x128xf32, #tpu.memory_space<vmem>>, vector<2x128xf32>,
    %c0_16 = arith.constant 0 : index
    %c0_17 = arith.constant 0 : index
    %38 = vector.load %arg11[%c0_16, %c0_17] : memref<2x128xf32, #tpu.memory_space<vmem>>, vector<2x128xf32>
    %c0_18 = arith.constant 0 : index
    %c0_19 = arith.constant 0 : index
    %c0_20 = arith.constant 0 : index
    %c0_21 = arith.constant 0 : index
    %39 = vector.load %arg5[%c0_18, %c0_19, %c0_20, %c0_21] : memref<1x2x2x128xf32, #tpu.memory_space<vmem>>, vector<1x2x2x128xf32>
    %40 = vector.extract_strided_slice %39 {offsets = [0, 0, 0, 0], sizes = [1, 1, 2, 128], strides = [1, 1, 1, 1]} : vector<1x2x2x128xf32> to vector<1x1x2x128xf32>
    %41 = vector.shape_cast %40 : vector<1x1x2x128xf32> to vector<2x128xf32>
    %42 = vector.extract_strided_slice %39 {offsets = [0, 1, 0, 0], sizes = [1, 1, 2, 128], strides = [1, 1, 1, 1]} : vector<1x2x2x128xf32> to vector<1x1x2x128xf32>
    %43 = vector.shape_cast %42 : vector<1x1x2x128xf32> to vector<2x128xf32>
    %44 = arith.subf %43, %41 : vector<2x128xf32>
    %45 = math.absf %44 : vector<2x128xf32>
    %cst_22 = arith.constant 0.000000e+00 : f32
    %46 = vector.broadcast %cst_22 : f32 to vector<2x128xf32>
    %47 = arith.maximumf %44, %46 : vector<2x128xf32>
    %48 = arith.subf %45, %47 : vector<2x128xf32>
    %49 = arith.select %6, %47, %48 : vector<2x128xi1>, vector<2x128xf32>
    %cst_23 = arith.constant 0.000000e+00 : f32
    %50 = vector.broadcast %cst_23 : f32 to vector<2x128xf32>
    %51 = arith.subf %50, %45 : vector<2x128xf32>
    %52 = math.exp %51 : vector<2x128xf32>
    %53 = math.log1p %52 : vector<2x128xf32>
    %54 = arith.addf %49, %53 : vector<2x128xf32>
    %55 = arith.mulf %17, %54 : vector<2x128xf32>
    %56 = arith.addf %38, %55 : vector<2x128xf32>
    %c0_24 = arith.constant 0 : index
    %c0_25 = arith.constant 0 : index
    %57 = vector.load %arg11[%c0_24, %c0_25] : memref<2x128xf32, #tpu.memory_space<vmem>>, vector<2x128xf32>
    tpu.vector_store %arg11[%c0_24, %c0_25], %56 {strides = array<i32>} : memref<2x128xf32, #tpu.memory_space<vmem>>, vector<2x128xf32>,
    %c0_26 = arith.constant 0 : index
    %c0_27 = arith.constant 0 : index
    %58 = vector.load %arg12[%c0_26, %c0_27] : memref<2x128xf32, #tpu.memory_space<vmem>>, vector<2x128xf32>
    %59 = arith.addf %58, %17 : vector<2x128xf32>
    %c0_28 = arith.constant 0 : index
    %c0_29 = arith.constant 0 : index
    %60 = vector.load %arg12[%c0_28, %c0_29] : memref<2x128xf32, #tpu.memory_space<vmem>>, vector<2x128xf32>
    tpu.vector_store %arg12[%c0_28, %c0_29], %59 {strides = array<i32>} : memref<2x128xf32, #tpu.memory_space<vmem>>, vector<2x128xf32>,
    %c0_i32_30 = arith.constant 0 : i32
    %61 = arith.cmpi eq, %arg2, %c0_i32_30 : i32
    %62 = arith.extui %61 : i1 to i32
    %c0_i32_31 = arith.constant 0 : i32
    %63 = arith.cmpi ne, %62, %c0_i32_31 : i32
    scf.if %63 {
      %c0_32 = arith.constant 0 : index
      %c0_33 = arith.constant 0 : index
      %64 = vector.load %arg10[%c0_32, %c0_33] : memref<2x128xf32, #tpu.memory_space<vmem>>, vector<2x128xf32>
      %cst_34 = arith.constant dense<0.000000e+00> : vector<128xf32>
      %65 = vector.multi_reduction <add>, %64, %cst_34 [0] : vector<2x128xf32> to vector<128xf32>
      %66 = vector.shape_cast %65 : vector<128xf32> to vector<1x128xf32>
      %c0_35 = arith.constant 0 : index
      %c0_36 = arith.constant 0 : index
      %c0_37 = arith.constant 0 : index
      %c0_38 = arith.constant 0 : index
      %67 = vector.load %arg7[%c0_35, %c0_36, %c0_37, %c0_38] : memref<1x1x1x128xf32, #tpu.memory_space<vmem>>, vector<1x1x1x128xf32>
      %68 = vector.shape_cast %67 : vector<1x1x1x128xf32> to vector<1x128xf32>
      %69 = vector.shape_cast %66 : vector<1x128xf32> to vector<1x1x1x128xf32>
      tpu.vector_store %arg7[%c0_35, %c0_36, %c0_37, %c0_38], %69 {strides = array<i32>} : memref<1x1x1x128xf32, #tpu.memory_space<vmem>>, vector<1x1x1x128xf32>,
      %c0_39 = arith.constant 0 : index
      %c0_40 = arith.constant 0 : index
      %70 = vector.load %arg11[%c0_39, %c0_40] : memref<2x128xf32, #tpu.memory_space<vmem>>, vector<2x128xf32>
      %cst_41 = arith.constant dense<0.000000e+00> : vector<128xf32>
      %71 = vector.multi_reduction <add>, %70, %cst_41 [0] : vector<2x128xf32> to vector<128xf32>
      %72 = vector.shape_cast %71 : vector<128xf32> to vector<1x128xf32>
      %c0_42 = arith.constant 0 : index
      %c0_43 = arith.constant 0 : index
      %c0_44 = arith.constant 0 : index
      %c0_45 = arith.constant 0 : index
      %73 = vector.load %arg8[%c0_42, %c0_43, %c0_44, %c0_45] : memref<1x1x1x128xf32, #tpu.memory_space<vmem>>, vector<1x1x1x128xf32>
      %74 = vector.shape_cast %73 : vector<1x1x1x128xf32> to vector<1x128xf32>
      %75 = vector.shape_cast %72 : vector<1x128xf32> to vector<1x1x1x128xf32>
      tpu.vector_store %arg8[%c0_42, %c0_43, %c0_44, %c0_45], %75 {strides = array<i32>} : memref<1x1x1x128xf32, #tpu.memory_space<vmem>>, vector<1x1x1x128xf32>,
      %c0_46 = arith.constant 0 : index
      %c0_47 = arith.constant 0 : index
      %76 = vector.load %arg12[%c0_46, %c0_47] : memref<2x128xf32, #tpu.memory_space<vmem>>, vector<2x128xf32>
      %cst_48 = arith.constant dense<0.000000e+00> : vector<128xf32>
      %77 = vector.multi_reduction <add>, %76, %cst_48 [0] : vector<2x128xf32> to vector<128xf32>
      %78 = vector.shape_cast %77 : vector<128xf32> to vector<1x128xf32>
      %c0_49 = arith.constant 0 : index
      %c0_50 = arith.constant 0 : index
      %c0_51 = arith.constant 0 : index
      %c0_52 = arith.constant 0 : index
      %79 = vector.load %arg9[%c0_49, %c0_50, %c0_51, %c0_52] : memref<1x1x1x128xf32, #tpu.memory_space<vmem>>, vector<1x1x1x128xf32>
      %80 = vector.shape_cast %79 : vector<1x1x1x128xf32> to vector<1x128xf32>
      %81 = vector.shape_cast %78 : vector<1x128xf32> to vector<1x1x1x128xf32>
      tpu.vector_store %arg9[%c0_49, %c0_50, %c0_51, %c0_52], %81 {strides = array<i32>} : memref<1x1x1x128xf32, #tpu.memory_space<vmem>>, vector<1x1x1x128xf32>,
    } else {
    }
    return
  }
  func.func @transform_0(%arg0: i32, %arg1: i32, %arg2: i32, %arg3: memref<2xf32, #tpu.memory_space<smem>>) -> (i32, i32, i32, i32) {
    %c1_i32 = arith.constant 1 : i32
    %0 = arith.muli %arg1, %c1_i32 : i32
    %1 = arith.addi %0, %arg2 : i32
    %c0_i32 = arith.constant 0 : i32
    %c0_i32_0 = arith.constant 0 : i32
    %c0_i32_1 = arith.constant 0 : i32
    return %arg0, %c0_i32, %1, %c0_i32_0 : i32, i32, i32, i32
  }
  func.func @transform_1(%arg0: i32, %arg1: i32, %arg2: i32, %arg3: memref<2xf32, #tpu.memory_space<smem>>) -> (i32, i32, i32, i32) {
    %c1_i32 = arith.constant 1 : i32
    %0 = arith.muli %arg1, %c1_i32 : i32
    %1 = arith.addi %0, %arg2 : i32
    %c0_i32 = arith.constant 0 : i32
    %c0_i32_0 = arith.constant 0 : i32
    %c0_i32_1 = arith.constant 0 : i32
    return %arg0, %c0_i32, %1, %c0_i32_0 : i32, i32, i32, i32
  }
  func.func @transform_2(%arg0: i32, %arg1: i32, %arg2: i32, %arg3: memref<2xf32, #tpu.memory_space<smem>>) -> (i32, i32, i32) {
    %c1_i32 = arith.constant 1 : i32
    %0 = arith.muli %arg1, %c1_i32 : i32
    %1 = arith.addi %0, %arg2 : i32
    %c0_i32 = arith.constant 0 : i32
    %c0_i32_0 = arith.constant 0 : i32
    return %arg0, %1, %c0_i32 : i32, i32, i32
  }
  func.func @transform_3(%arg0: i32, %arg1: i32, %arg2: i32, %arg3: memref<2xf32, #tpu.memory_space<smem>>) -> (i32, i32, i32, i32) {
    %c0_i32 = arith.constant 0 : i32
    %c0_i32_0 = arith.constant 0 : i32
    %c0_i32_1 = arith.constant 0 : i32
    return %arg0, %arg1, %c0_i32, %c0_i32_0 : i32, i32, i32, i32
  }
  func.func @transform_4(%arg0: i32, %arg1: i32, %arg2: i32, %arg3: memref<2xf32, #tpu.memory_space<smem>>) -> (i32, i32, i32, i32) {
    %c0_i32 = arith.constant 0 : i32
    %c0_i32_0 = arith.constant 0 : i32
    %c0_i32_1 = arith.constant 0 : i32
    return %arg0, %arg1, %c0_i32, %c0_i32_0 : i32, i32, i32, i32
  }
  func.func @transform_5(%arg0: i32, %arg1: i32, %arg2: i32, %arg3: memref<2xf32, #tpu.memory_space<smem>>) -> (i32, i32, i32, i32) {
    %c0_i32 = arith.constant 0 : i32
    %c0_i32_0 = arith.constant 0 : i32
    %c0_i32_1 = arith.constant 0 : i32
    return %arg0, %arg1, %c0_i32, %c0_i32_0 : i32, i32, i32, i32
  }
}

</mosaic_0001>

<bundles_post_ra>
// kernel: multi_task_loss_wo.1
= control target key start
LH: loop header
LB: loop body
LE: loop exit
PB: predicated region body
PF: predicated region fallthrough
CT: control target
= control target key end

     0   :  { %s847_s0 = inlined_call_operand.vmem [shape: f32[2], index: 0, kind: input, shape index: {}]   ;;  %s848_s1 = inlined_call_operand.vmem [shape: f32[2,2,2,128], index: 1, kind: input, shape index: {}]   ;;  %s849_s2 = inlined_call_operand.vmem [shape: f32[2,2,2,128], index: 2, kind: input, shape index: {}]   ;;  %s850_s3 = inlined_call_operand.vmem [shape: s32[2,2,128], index: 3, kind: input, shape index: {}]   ;;  %s851_s4 = inlined_call_operand.vmem [shape: f32[2,1,1,128], index: 4, kind: output, shape index: {0}]   ;;  %s852_s5 = inlined_call_operand.vmem [shape: f32[2,1,1,128], index: 5, kind: output, shape index: {1}]   ;;  %s853_s6 = inlined_call_operand.vmem [shape: f32[2,1,1,128], index: 6, kind: output, shape index: {2}]  }
   0x1   :  { %s12_s23 = sshll.u32 %s847_s0, 4  ;;  %s13_s23 = int_to_ptr.vmem [resolvable:$true] %s12_s23 }
   0x2   :  { %s704_s24 = scalar_lea.vmem %s13_s23, 16  ;;  %p709_p1 = scmp.lt.s32.totalorder %s13_s23, %s13_s23 }
   0x3   :  { %p705_p0 = scmp.ne.s32.totalorder %s13_s23, %s704_s24  ;;  %p710_p2 = scmp.lt.s32.totalorder %s704_s24, %s704_s24 }
   0x5   :  { %p711_p3 = por %p710_p2, %p709_p1 }
   0x7   :  { %p712_p4 = pnand %p711_p3, %p705_p0 }
   0x9   :  { %715 = shalt.err (!%p712_p4)  }
   0xa   :  { %s742_s25 = smov [#allocation6]  }
   0xb   :  { %15 = dma.vmem_to_smem %s13_s23, 16, %s742_s25, [#allocation5] }
   0xc   :  { %728 = dma.done.wait [#allocation5], 16 }
   0xd   :  { %729 = vsyncadd [#allocation5], 4294967280 }
   0xe   :  { %17 = sfence }
   0xf   :  { %s782_s26 = smov 0   ;;  %s784_s27 = smov 0  }
  0x10   :  { %s786_s28 = smov 0  }
  0x11 LB: > { %s42_s0 = sadd.s32 1, %s736_s27  ;;  %p659_p5 = scmp.ge.s32.totalorder %s740_s28, 1  ;;  %s740_s28 = sphi %s786_s28, %s23_s28   ;;  %s736_s27 = sphi %s784_s27, %s855_s27   ;;  %s732_s26 = sphi %s782_s26, %s854_s26  }
  0x12   : > { %p44_p6 = scmp.ge.s32.totalorder %s42_s0, 2  ;;  %p270_p7 = scmp.lt.s32.totalorder %s740_s28, 3 }
  0x14   : > { %s857_s0 = smov (%p44_p6, %s42_s0), 0  ;;  %p271_p8 = pnand %p659_p5, %p270_p7 }
  0x15   : > { %p333_p9 = scmp.lt.s32.totalorder (!%p271_p8), %s732_s26, 1  ;;  %s389_s29 = sld [smem:[#allocation6]] (!%p271_p8)  ;;  %v743_v0 = vmov (!%p271_p8), 0.0   ;;  %vm451_vm2 = vcmask (!%p271_p8), 1041408  }
  0x16   : > { %274 = sbr.rel (%p271_p8) target bundleno = 98 (0x62), region = 32  ;;  %385 = vst [vmem:[#allocation4] sm:$0x3] (!%p271_p8), %v743_v0  ;;  %383 = vst [vmem:[#allocation2] sm:$0x3] (!%p271_p8), %v743_v0  ;;  %s665_s30 = sld [smem:[#allocation6 + $0x1]] (!%p271_p8) }
  0x17   : > { %384 = vst [vmem:[#allocation3] sm:$0x3] (!%p271_p8), %v743_v0 }
  0x1b   : > { %v390_v2 = vstv (!%p271_p8), %s389_s29 }
  0x1c   : > { %v393_v5 = vstv (!%p271_p8), %s665_s30 }
  0x1d   : > { %s859_s26 = smov (!%p333_p9, %s732_s26), 1  ;;  %v444_v11 = vld [vmem:[#allocation4] sm:$0x3]  ;;  %v396_v54 = vld [vmem:[#allocation2] sm:$0x3] }
  0x1e   : > { %s664_s7 = sshll.u32 %s859_s26, 1  ;;  %s668_s8 = sshll.u32 %s859_s26, 2  ;;  %v420_v57 = vld [vmem:[#allocation3] sm:$0x3] }
  0x1f   : > { %s359_s11 = scalar_lea.vmem %s850_s3, %s664_s7  ;;  %s340_s14 = scalar_lea.vmem %s848_s1, %s668_s8 }
  0x20   : > { %v810_v1 = vld [vmem:[%s359_s11] sm:$0x3]  ;;  %v398_v4 = vld [vmem:[%s340_s14 + $0x2] sm:$0x3]  ;;  %s350_s17 = scalar_lea.vmem %s849_s2, %s668_s8  ;;  %s378_s20 = scalar_lea.vmem %s853_s6, %s859_s26 }
  0x21   : > { %v397_v3 = vld [vmem:[%s340_s14] sm:$0x3]  ;;  %vm387_vm0 = vcmp.eq.s32.totalorder %v810_v1, 0  ;;  %vm388_vm1 = vcmp.eq.s32.totalorder %v810_v1, 1  ;;  %v422_v8 = vld [vmem:[%s350_s17 + $0x2] sm:$0x3]  ;;  %s366_s23 = scalar_lea.vmem %s851_s4, %s859_s26  ;;  %s372_s29 = scalar_lea.vmem %s852_s5, %s859_s26 }
  0x22   : > { %v399_v6 = vsub.f32 %v398_v4, %v397_v3  ;;  %v421_v7 = vld [vmem:[%s350_s17] sm:$0x3]  ;;  %v391_v9 = vsel %vm387_vm0, %v390_v2, 0.0  ;;  %v394_v10 = vsel %vm388_vm1, %v393_v5, 0.0 }
  0x23   : > { %v423_v12 = vsub.f32 %v422_v8, %v421_v7  ;;  %v395_v13 = vadd.f32 %v394_v10, %v391_v9 }
  0x24   : > { %v400_v14 = vand.u32 2147483647, %v399_v6  ;;  %v401_v34 = vmax.f32 %v399_v6, 0.0 }
  0x25   : > { %v424_v15 = vand.u32 2147483647, %v423_v12  ;;  %v445_v16 = vadd.f32 %v444_v11, %v395_v13  ;;  %v425_v35 = vmax.f32 %v423_v12, 0.0 }
  0x26   : > { %v404_v17 = vsub.f32 0.0, %v400_v14  ;;  %v402_v40 = vsub.f32 %v400_v14, %v401_v34 }
  0x27   : > { %v428_v18 = vsub.f32 0.0, %v424_v15  ;;  %446 = vst [vmem:[#allocation4] sm:$0x3] %v445_v16  ;;  %v426_v42 = vsub.f32 %v424_v15, %v425_v35 }
  0x28   : > { %v405_v19 = vmul.f32 1.442695, %v404_v17  ;;  %v403_v47 = vsel %vm387_vm0, %v401_v34, %v402_v40 }
  0x29   : > { %v429_v20 = vmul.f32 1.442695, %v428_v18  ;;  %v427_v49 = vsel %vm387_vm0, %v425_v35, %v426_v42 }
  0x2a   : > { %696 = vpow2.f32 %v405_v19 }
  0x2b   : > { %698 = vpow2.f32 %v429_v20 }
  0x2e   : > { %v469_v21 = vld [vmem:[#allocation4] sm:$0x3] }
  0x2f   : > { %v470_v22 = vsel %vm451_vm2, %v469_v21, 0.0 }
  0x30   : > { %v471_v23 = vrot.slane %v470_v22, 4 }
  0x32   : > { %v472_v24 = vadd.f32 %v471_v23, %v470_v22 }
  0x34   : > { %v697_v25 = vpop.eup %696  ;;  %v473_v28 = vrot.slane %v472_v24, 2 }
  0x35   : > { %v699_v26 = vpop.eup %698  ;;  %v407_v27 = vadd.f32 1.0, %v697_v25  ;;  %v410_v31 = vmul.f32 -0.5, %v697_v25  ;;  %v413_v38 = vand.u32 2147483647, %v697_v25 }
  0x36   : > { %v431_v29 = vadd.f32 1.0, %v699_v26  ;;  %v474_v30 = vadd.f32 %v473_v28, %v472_v24  ;;  %v434_v32 = vmul.f32 -0.5, %v699_v26  ;;  %v437_v41 = vand.u32 2147483647, %v699_v26 }
  0x37   : > { %700 = vlog2.f32 %v407_v27  ;;  %v411_v37 = vadd.f32 1.0, %v410_v31  ;;  %vm414_vm3 = vcmp.lt.f32.partialorder %v413_v38, 0.0004427343 }
  0x38   : > { %702 = vlog2.f32 %v431_v29  ;;  %v475_v33 = vrot.slane %v474_v30, 1  ;;  %v435_v39 = vadd.f32 1.0, %v434_v32  ;;  %vm438_vm4 = vcmp.lt.f32.partialorder %v437_v41, 0.0004427343 }
  0x39   : > { %v412_v43 = vmul.f32 %v697_v25, %v411_v37 }
  0x3a   : > { %v476_v36 = vadd.f32 %v475_v33, %v474_v30  ;;  %v436_v45 = vmul.f32 %v699_v26, %v435_v39 }
  0x3c   : > { %477 = vst [vmem:[%s378_s20] sm:$0x1] %v476_v36 }
  0x41   : > { %v701_v44 = vpop.eup %700 }
  0x42   : > { %v703_v46 = vpop.eup %702  ;;  %v409_v48 = vmul.f32 0.6931472, %v701_v44 }
  0x43   : > { %v433_v50 = vmul.f32 0.6931472, %v703_v46 }
  0x44   : > { %v415_v51 = vsel %vm414_vm3, %v412_v43, %v409_v48 }
  0x45   : > { %v416_v52 = vadd.f32 %v415_v51, %v403_v47  ;;  %v439_v53 = vsel %vm438_vm4, %v436_v45, %v433_v50 }
  0x46   : > { %v440_v55 = vadd.f32 %v439_v53, %v427_v49 }
  0x47   : > { %v417_v56 = vmul.f32 %v416_v52, %v395_v13 }
  0x48   : > { %v441_v58 = vmul.f32 %v440_v55, %v395_v13 }
  0x49   : > { %v418_v59 = vadd.f32 %v417_v56, %v396_v54 }
  0x4a   : > { %v442_v60 = vadd.f32 %v441_v58, %v420_v57 }
  0x4b   : > { %419 = vst [vmem:[#allocation2] sm:$0x3] %v418_v59 }
  0x4c   : > { %443 = vst [vmem:[#allocation3] sm:$0x3] %v442_v60 }
  0x52   : > { %v450_v61 = vld [vmem:[#allocation2] sm:$0x3] }
  0x53   : > { %v452_v62 = vsel %vm451_vm2, %v450_v61, 0.0  ;;  %v460_v63 = vld [vmem:[#allocation3] sm:$0x3] }
  0x54   : > { %v453_v0 = vrot.slane %v452_v62, 4  ;;  %v461_v1 = vsel %vm451_vm2, %v460_v63, 0.0 }
  0x55   : > { %v462_v2 = vrot.slane %v461_v1, 4 }
  0x56   : > { %v454_v3 = vadd.f32 %v453_v0, %v452_v62 }
  0x57   : > { %v463_v4 = vadd.f32 %v462_v2, %v461_v1 }
  0x58   : > { %v455_v5 = vrot.slane %v454_v3, 2 }
  0x59   : > { %v464_v6 = vrot.slane %v463_v4, 2 }
  0x5a   : > { %v456_v7 = vadd.f32 %v455_v5, %v454_v3 }
  0x5b   : > { %v465_v8 = vadd.f32 %v464_v6, %v463_v4 }
  0x5c   : > { %v457_v9 = vrot.slane %v456_v7, 1 }
  0x5d   : > { %v466_v10 = vrot.slane %v465_v8, 1 }
  0x5e   : > { %v458_v11 = vadd.f32 %v457_v9, %v456_v7 }
  0x5f   : > { %v467_v12 = vadd.f32 %v466_v10, %v465_v8 }
  0x60   : > { %459 = vst [vmem:[%s366_s23] sm:$0x1] %v458_v11 }
  0x61   : > { %468 = vst [vmem:[%s372_s29] sm:$0x1] %v467_v12 }
  0x62 PF: > { %s23_s28 = sadd.s32 1, %s740_s28   ;;  %s854_s26 = smov %s736_s27 }
  0x63   : > { %p20_p10 = scmp.ge.s32.totalorder %s23_s28, 4   ;;  %s855_s27 = smov %s857_s0 }
  0x65   :  { %22 = sbr.rel (!%p20_p10) target bundleno = 17 (0x11), region = 100 }

</bundles_post_ra>
